<compile_context>
chip_gen: v7x
topology: tpu7x:2x2x1
jax: 0.10.0
libtpu: 0.0.40
codegen_flags: <defaults>
</compile_context>

<pallas_src>
import functools

import jax
import jax.numpy as jnp
from jax.experimental import pallas as pl
from jax.experimental.pallas import tpu as pltpu


def _round_up(x, m):
    return (x + m - 1) // m * m


def _cdiv(a, b):
    return -(-a // b)


def _pick_tb(batch, state_dim):
    """Pick the batch tile (multiple of 128 rows).

    - Large tiles (up to 2048 rows) to amortize the ~0.35 us per-grid-step
      overhead on v5e/v6e.
    - VMEM-aware cap: the f32 state tile is double-buffered by the pipeline;
      keep 2 * tb * state_dim * 4 bytes comfortably under the scoped-VMEM
      limit (important on v7x: 64 MiB physical / 32 MiB default scoped).
    - When more than one tile is needed, use an even tile count so the
      "parallel" grid axis splits evenly across v7x's two TensorCores.
    """
    b128 = _round_up(max(batch, 1), 128)

    budget = 20 * 1024 * 1024                  # leave headroom under 32 MiB
    per_row = 2 * 4 * max(state_dim, 1)        # double-buffered f32 input row
    max_by_vmem = max(128, (budget // per_row) // 128 * 128)
    cap = min(2048, max_by_vmem)

    if b128 <= 128:
        return 128                              # single small tile

    n = max(2, _cdiv(b128, cap))                # >= 2 tiles
    if n % 2:                                   # even split for v7x megacore
        n += 1
    tb = _round_up(_cdiv(b128, n), 128)
    return min(tb, cap)


def _critic_kernel(x_ref, w1_ref, b1_ref, w2_ref, b2_ref, w3_ref, b3_ref,
                   o_ref):
    # x_ref : (TB, S) f32        w1: (S, 256) bf16   b1: (1, 256) f32
    # w2    : (256, 128) bf16    b2: (1, 128) f32
    # w3    : (1, 128) f32 (row) b3: (1, 1) f32 in SMEM
    # o_ref : (1, TB) f32  (lane-dense row of values for this batch tile)
    #
    # NOTE: when B % TB != 0 the last tile contains undefined trailing rows
    # (masked partial input block).  Rows never interact (no cross-row
    # reduction in this network), so those garbage values stay confined to
    # output lanes the wrapper slices off.  Do NOT add any cross-row op here
    # without restoring explicit padding/masking.
    x = x_ref[...].astype(jnp.bfloat16)

    h1 = jnp.dot(x, w1_ref[...], preferred_element_type=jnp.float32)
    h1 = jnp.maximum(h1 + b1_ref[...], 0.0)                       # ReLU (f32)

    h2 = jnp.dot(h1.astype(jnp.bfloat16), w2_ref[...],
                 preferred_element_type=jnp.float32)
    h2 = jnp.maximum(h2 + b2_ref[...], 0.0)                       # ReLU (f32)

    # Final 128 -> 1 layer: v[0, b] = sum_k w3[0, k] * h2[b, k].
    # Contracting the last dim of both operands yields the lane-dense (1, TB)
    # row directly (no masked single-lane stores, no N=1 MXU column).
    v = jax.lax.dot_general(
        w3_ref[...], h2,
        dimension_numbers=(((1,), (1,)), ((), ())),
        preferred_element_type=jnp.float32)                        # (1, TB)

    o_ref[...] = (v + b3_ref[0, 0]).astype(o_ref.dtype)


@functools.partial(jax.jit, static_argnames=("tb",))
def critic_forward(state, params, tb=None):
    """Pallas implementation of CriticNetwork.forward.

    state:  (B, state_dim) float32
    params: dict with w1 (S,256), b1 (1,256), w2 (256,128), b2 (1,128),
            w3 (128,1), b3 (1,1)   (x @ W + b convention == PyTorch x @ W.T + b)
    returns (B, 1) float32
    """
    B, S = state.shape
    if tb is None:
        tb = _pick_tb(B, S)

    # Weights cast to bf16 once (halves weight DMA, doubles MXU rate); biases
    # and the tiny final layer stay f32.  If full f32 fidelity is required,
    # drop these casts (and the in-kernel bf16 casts) — the kernel structure
    # is dtype-agnostic.
    w1 = params["w1"].astype(jnp.bfloat16)
    w2 = params["w2"].astype(jnp.bfloat16)
    b1 = params["b1"].astype(jnp.float32)
    b2 = params["b2"].astype(jnp.float32)
    w3 = params["w3"].reshape(1, -1).astype(jnp.float32)    # (1, 128) row
    b3 = params["b3"].reshape(1, 1).astype(jnp.float32)     # scalar -> SMEM

    # No input padding: pl.cdiv-sized grid + masked ragged last block.  The
    # output slab is padded to a whole number of tiles so every output store
    # is a full, unmasked lane-dense (1, tb) row; the pad is never read back.
    n_tiles = _cdiv(B, tb)
    B_pad = n_tiles * tb

    flops = 2 * B * (S * 256 + 256 * 128 + 128)
    bytes_accessed = (B * S * 4                # state in (read once, no pad pass)
                      + w1.size * 2 + w2.size * 2
                      + b1.size * 4 + b2.size * 4 + w3.size * 4 + 4
                      + B_pad * 4)             # values out

    # Grid-invariant weights/biases: their index maps return block (0, 0) at
    # every step, so the pipeline does not re-DMA them between steps.
    full = lambda a: pl.BlockSpec(a.shape, lambda i: (0,) * a.ndim)

    out_row = pl.pallas_call(
        _critic_kernel,
        out_shape=jax.ShapeDtypeStruct((1, B_pad), jnp.float32),
        grid_spec=pltpu.PrefetchScalarGridSpec(
            num_scalar_prefetch=0,
            grid=(n_tiles,),
            in_specs=[
                pl.BlockSpec((tb, S), lambda i: (i, 0)),           # state tile
                full(w1), full(b1),
                full(w2), full(b2),
                full(w3),
                pl.BlockSpec(memory_space=pltpu.MemorySpace.SMEM),  # b3 scalar
            ],
            # Lane-dense output: one (1, tb) row per grid step.
            out_specs=pl.BlockSpec((1, tb), lambda i: (0, i)),
        ),
        compiler_params=pltpu.CompilerParams(
            dimension_semantics=("parallel",),
            vmem_limit_bytes=32 * 1024 * 1024),
        cost_estimate=pl.CostEstimate(
            flops=flops, transcendentals=0, bytes_accessed=bytes_accessed),
    )(state, w1, b1, w2, b2, w3, b3)

    # Layout plumbing back to the PyTorch (B, 1) shape (tiny XLA slice/reshape).
    return out_row[0, :B].reshape(B, 1)


def init_critic_params(key, state_dim):
    """Deterministic init matching PyTorch Linear default:
    U(-1/sqrt(fan_in), 1/sqrt(fan_in)) for both weight and bias."""
    dims = [(state_dim, 256), (256, 128), (128, 1)]
    params = {}
    for idx, (fan_in, fan_out) in enumerate(dims, start=1):
        key, kw, kb = jax.random.split(key, 3)
        bound = 1.0 / jnp.sqrt(jnp.float32(fan_in))
        params[f"w{idx}"] = jax.random.uniform(
            kw, (fan_in, fan_out), jnp.float32, -bound, bound)
        params[f"b{idx}"] = jax.random.uniform(
            kb, (1, fan_out), jnp.float32, -bound, bound)
    return params


def critic_forward_ref(state, params):
    """Plain-JAX f32 reference for correctness check."""
    h = jnp.maximum(state @ params["w1"] + params["b1"], 0.0)
    h = jnp.maximum(h @ params["w2"] + params["b2"], 0.0)
    return h @ params["w3"] + params["b3"]


if __name__ == "__main__":
    key = jax.random.PRNGKey(0)
    k_params, k_state = jax.random.split(key)

    # batch=200 exercises the un-padded ragged last block (200 rows, 2 tiles
    # of 128) and the even multi-step grid.
    batch, state_dim = 200, 32
    params = init_critic_params(k_params, state_dim)
    state = jax.random.normal(k_state, (batch, state_dim), jnp.float32)

    out = jax.block_until_ready(critic_forward(state, params))

    ref = critic_forward_ref(state, params)
    assert out.shape == (batch, 1), out.shape
    # Tolerance loosened for bf16 matmul inputs (f32 accumulation).
    assert jnp.allclose(out, ref, atol=5e-2, rtol=5e-2), "mismatch vs reference"

    print("KERNEL_OK")
</pallas_src>

<mosaic_0001>
module attributes {stable_mosaic.version = 11 : i64} {
  func.func @_critic_kernel(%arg0: i32, %arg1: memref<128x32xf32, #tpu.memory_space<vmem>>, %arg2: memref<32x256xbf16, #tpu.memory_space<vmem>>, %arg3: memref<1x256xf32, #tpu.memory_space<vmem>>, %arg4: memref<256x128xbf16, #tpu.memory_space<vmem>>, %arg5: memref<1x128xf32, #tpu.memory_space<vmem>>, %arg6: memref<1x128xf32, #tpu.memory_space<vmem>>, %arg7: memref<1x1xf32, #tpu.memory_space<smem>>, %arg8: memref<1x128xf32, #tpu.memory_space<vmem>>) attributes {dimension_semantics = [#tpu.dimension_semantics<parallel>], iteration_bounds = array<i64: 2>, scalar_prefetch = 0 : i64, scratch_operands = 0 : i64, tpu.core_type = #tpu.core_type<tc>, window_params = [{transform_indices = @transform_0, window_bounds = array<i64: 128, 32>}, {pipeline_mode = #tpu.pipeline_mode<synchronous>, transform_indices = @transform_1, window_bounds = array<i64: 32, 256>}, {pipeline_mode = #tpu.pipeline_mode<synchronous>, transform_indices = @transform_2, window_bounds = array<i64: 1, 256>}, {pipeline_mode = #tpu.pipeline_mode<synchronous>, transform_indices = @transform_3, window_bounds = array<i64: 256, 128>}, {pipeline_mode = #tpu.pipeline_mode<synchronous>, transform_indices = @transform_4, window_bounds = array<i64: 1, 128>}, {pipeline_mode = #tpu.pipeline_mode<synchronous>, transform_indices = @transform_5, window_bounds = array<i64: 1, 128>}, {transform_indices = @transform_6, window_bounds = array<i64: 1, 1>}, {transform_indices = @transform_7, window_bounds = array<i64: 1, 128>}]} {
    %c0 = arith.constant 0 : index
    %c0_0 = arith.constant 0 : index
    %0 = vector.load %arg1[%c0, %c0_0] : memref<128x32xf32, #tpu.memory_space<vmem>>, vector<128x32xf32>
    %1 = arith.truncf %0 : vector<128x32xf32> to vector<128x32xbf16>
    %c0_1 = arith.constant 0 : index
    %c0_2 = arith.constant 0 : index
    %2 = vector.load %arg2[%c0_1, %c0_2] : memref<32x256xbf16, #tpu.memory_space<vmem>>, vector<32x256xbf16>
    %cst = arith.constant dense<0.000000e+00> : vector<128x256xf32>
    %3 = tpu.matmul %1, %2, %cst {dimension_numbers = #tpu.dot_dimension_numbers<[1], [0], [0], [1], [0, 0, 1, 1], [], []>} : vector<128x32xbf16>, vector<32x256xbf16>, vector<128x256xf32> -> vector<128x256xf32>
    %c0_3 = arith.constant 0 : index
    %c0_4 = arith.constant 0 : index
    %4 = vector.load %arg3[%c0_3, %c0_4] : memref<1x256xf32, #tpu.memory_space<vmem>>, vector<1x256xf32>
    %5 = vector.broadcast %4 : vector<1x256xf32> to vector<128x256xf32>
    %6 = arith.addf %3, %5 : vector<128x256xf32>
    %cst_5 = arith.constant 0.000000e+00 : f32
    %7 = vector.broadcast %cst_5 : f32 to vector<128x256xf32>
    %8 = arith.maximumf %6, %7 : vector<128x256xf32>
    %9 = arith.truncf %8 : vector<128x256xf32> to vector<128x256xbf16>
    %c0_6 = arith.constant 0 : index
    %c0_7 = arith.constant 0 : index
    %10 = vector.load %arg4[%c0_6, %c0_7] : memref<256x128xbf16, #tpu.memory_space<vmem>>, vector<256x128xbf16>
    %cst_8 = arith.constant dense<0.000000e+00> : vector<128x128xf32>
    %11 = tpu.matmul %9, %10, %cst_8 {dimension_numbers = #tpu.dot_dimension_numbers<[1], [0], [0], [1], [0, 0, 1, 1], [], []>} : vector<128x256xbf16>, vector<256x128xbf16>, vector<128x128xf32> -> vector<128x128xf32>
    %c0_9 = arith.constant 0 : index
    %c0_10 = arith.constant 0 : index
    %12 = vector.load %arg5[%c0_9, %c0_10] : memref<1x128xf32, #tpu.memory_space<vmem>>, vector<1x128xf32>
    %13 = vector.broadcast %12 : vector<1x128xf32> to vector<128x128xf32>
    %14 = arith.addf %11, %13 : vector<128x128xf32>
    %cst_11 = arith.constant 0.000000e+00 : f32
    %15 = vector.broadcast %cst_11 : f32 to vector<128x128xf32>
    %16 = arith.maximumf %14, %15 : vector<128x128xf32>
    %c0_12 = arith.constant 0 : index
    %c0_13 = arith.constant 0 : index
    %17 = vector.load %arg6[%c0_12, %c0_13] : memref<1x128xf32, #tpu.memory_space<vmem>>, vector<1x128xf32>
    %cst_14 = arith.constant dense<0.000000e+00> : vector<1x128xf32>
    %18 = tpu.matmul %17, %16, %cst_14 {dimension_numbers = #tpu.dot_dimension_numbers<[1], [1], [0], [0], [0, 0, 1, 0], [], []>} : vector<1x128xf32>, vector<128x128xf32>, vector<1x128xf32> -> vector<1x128xf32>
    %c0_15 = arith.constant 0 : index
    %c0_16 = arith.constant 0 : index
    %19 = memref.load %arg7[%c0_15, %c0_16] : memref<1x1xf32, #tpu.memory_space<smem>>
    %20 = vector.broadcast %19 : f32 to vector<1x128xf32>
    %21 = arith.addf %18, %20 : vector<1x128xf32>
    %c0_17 = arith.constant 0 : index
    %c0_18 = arith.constant 0 : index
    %22 = vector.load %arg8[%c0_17, %c0_18] : memref<1x128xf32, #tpu.memory_space<vmem>>, vector<1x128xf32>
    tpu.vector_store %arg8[%c0_17, %c0_18], %21 {strides = array<i32>} : memref<1x128xf32, #tpu.memory_space<vmem>>, vector<1x128xf32>,
    return
  }
  func.func @transform_0(%arg0: i32) -> (i32, i32) {
    %c0_i32 = arith.constant 0 : i32
    %c0_i32_0 = arith.constant 0 : i32
    return %arg0, %c0_i32 : i32, i32
  }
  func.func @transform_1(%arg0: i32) -> (i32, i32) {
    %c0_i32 = arith.constant 0 : i32
    %c0_i32_0 = arith.constant 0 : i32
    %c0_i32_1 = arith.constant 0 : i32
    return %c0_i32, %c0_i32_0 : i32, i32
  }
  func.func @transform_2(%arg0: i32) -> (i32, i32) {
    %c0_i32 = arith.constant 0 : i32
    %c0_i32_0 = arith.constant 0 : i32
    %c0_i32_1 = arith.constant 0 : i32
    return %c0_i32, %c0_i32_0 : i32, i32
  }
  func.func @transform_3(%arg0: i32) -> (i32, i32) {
    %c0_i32 = arith.constant 0 : i32
    %c0_i32_0 = arith.constant 0 : i32
    %c0_i32_1 = arith.constant 0 : i32
    return %c0_i32, %c0_i32_0 : i32, i32
  }
  func.func @transform_4(%arg0: i32) -> (i32, i32) {
    %c0_i32 = arith.constant 0 : i32
    %c0_i32_0 = arith.constant 0 : i32
    %c0_i32_1 = arith.constant 0 : i32
    return %c0_i32, %c0_i32_0 : i32, i32
  }
  func.func @transform_5(%arg0: i32) -> (i32, i32) {
    %c0_i32 = arith.constant 0 : i32
    %c0_i32_0 = arith.constant 0 : i32
    %c0_i32_1 = arith.constant 0 : i32
    return %c0_i32, %c0_i32_0 : i32, i32
  }
  func.func @transform_6(%arg0: i32) -> (i32, i32) {
    %c0_i32 = arith.constant 0 : i32
    %c0_i32_0 = arith.constant 0 : i32
    %c0_i32_1 = arith.constant 0 : i32
    return %c0_i32, %c0_i32_0 : i32, i32
  }
  func.func @transform_7(%arg0: i32) -> (i32, i32) {
    %c0_i32 = arith.constant 0 : i32
    %c0_i32_0 = arith.constant 0 : i32
    return %c0_i32, %arg0 : i32, i32
  }
}

</mosaic_0001>

<bundles_post_ra>
// kernel: critic_forward.1
= control target key start
LH: loop header
LB: loop body
LE: loop exit
PB: predicated region body
PF: predicated region fallthrough
CT: control target
= control target key end

     0   :  { %s1181_s26 = smov 0   ;;  %s1368_s0 = inlined_call_operand.vmem [shape: f32[200,32], index: 0, kind: input, shape index: {}]   ;;  %s1369_s1 = inlined_call_operand.vmem [shape: bf16[32,256], index: 1, kind: input, shape index: {}]   ;;  %s1370_s2 = inlined_call_operand.vmem [shape: f32[1,256], index: 2, kind: input, shape index: {}]   ;;  %s1371_s3 = inlined_call_operand.vmem [shape: bf16[256,128], index: 3, kind: input, shape index: {}]   ;;  %s1372_s4 = inlined_call_operand.vmem [shape: f32[1,128], index: 4, kind: input, shape index: {}]   ;;  %s1373_s5 = inlined_call_operand.vmem [shape: f32[1,128], index: 5, kind: input, shape index: {}]   ;;  %s1374_s6 = inlined_call_operand.<no memory space> [shape: f32[1,1], index: 6, kind: input, shape index: {}]   ;;  %s1375_s7 = inlined_call_operand.vmem [shape: f32[1,256], index: 7, kind: output, shape index: {}]  }
   0x1   :  { %12 = sst [smem:[#allocation2]] %s1374_s6 }
   0x2 LB: > { %s1187_s27 = sadd.s32 4294967295, %s1132_s26   ;;  %p918_p0 = scmp.ge.s32.totalorder %s1132_s26, 1  ;;  %s1132_s26 = sphi %s1181_s26, %s18_s26  }
   0x3   : > { %p247_p1 = scmp.lt.s32.totalorder %s1132_s26, 3 }
   0x5   : > { %p248_p2 = pnand %p918_p0, %p247_p1 }
   0x6   : > { %v1104_v0 = vld [vmem:[%s1369_s1 + $0x4] ss:$8 sps:$4 sm:$0xff] (!%p248_p2)   ;;  %s919_s6 = sshll.u32 (!%p248_p2), %s1187_s27, 4  ;;  %v1106_v1 = vld [vmem:[%s1369_s1] ss:$8 sps:$4 sm:$0xff] (!%p248_p2)   ;;  %v1134_v2 = vmov (!%p248_p2), 0   ;;  %v329_v45 = vlaneseq (!%p248_p2) }
   0x7   : > { %251 = sbr.rel (%p248_p2) target bundleno = 743 (0x2e7), region = 48  ;;  %416 = vmatprep.mubr.bf16.mxu0 (!%p248_p2), %v1134_v2  ;;  %p286_p3 = scmp.lt.s32.totalorder (!%p248_p2), %s919_s6, 24  ;;  %384 = vmatprep.subr.bf16.mxu0 (!%p248_p2), %v1104_v0  ;;  %v1107_v3 = vld [vmem:[%s1369_s1 + $0x14] ss:$8 sps:$4 sm:$0xff] (!%p248_p2)   ;;  %v1109_v4 = vld [vmem:[%s1369_s1 + $0x10] ss:$8 sps:$4 sm:$0xff] (!%p248_p2)  }
   0x8   : > { %385 = vmatpush1.bf16.msra.mxu0 (!%p248_p2), %v1106_v1  ;;  %v1110_v5 = vld [vmem:[%s1371_s3 + $0x40] sm:$0xff] (!%p248_p2)   ;;  %v1112_v7 = vld [vmem:[%s1371_s3 + $0x48] sm:$0xff] (!%p248_p2)   ;;  %vm359_vm0 = vcmask (!%p248_p2), 261120   ;;  %v1114_v14 = vld [vmem:[%s1371_s3 + $0x50] sm:$0xff] (!%p248_p2)   ;;  %v330_v46 = vshrl.u32 (!%p248_p2), %v329_v45, 7  ;;  %vm1136_vm1 = vmmov (!%p248_p2), 0  }
   0x9   : > { %386 = vmatprep.subr.bf16.mxu0 (!%p248_p2), %v1107_v3  ;;  %v1111_v6 = vld [vmem:[%s1371_s3] sm:$0xff] (!%p248_p2)   ;;  %952 = vmatprep.subr.bf16.mxu1 (!%p248_p2), %v1110_v5  ;;  %v1113_v8 = vld [vmem:[%s1371_s3 + $0x8] sm:$0xff] (!%p248_p2)   ;;  %v1115_v15 = vld [vmem:[%s1371_s3 + $0x10] sm:$0xff] (!%p248_p2)   ;;  %s794_s11 = sld [smem:[#allocation2]] (!%p248_p2)  ;;  %p295_p4 = scmp.lt.s32.totalorder (!%p248_p2), %s1187_s27, 1 }
   0xa   : > { %953 = vmatpush3.bf16.msra.mxu1 (!%p248_p2), %v1111_v6  ;;  %v1116_v17 = vld [vmem:[%s1371_s3 + $0x58] sm:$0xff] (!%p248_p2)   ;;  %v1118_v19 = vld [vmem:[%s1371_s3 + $0x60] sm:$0xff] (!%p248_p2)   ;;  %v1120_v23 = vld [vmem:[%s1371_s3 + $0x68] sm:$0xff] (!%p248_p2)   ;;  %v331_v47 = vsub.s32 (!%p248_p2), 0, %v330_v46  ;;  %v335_v49 = vsub.s32 (!%p248_p2), 1, %v330_v46 }
   0xb   : > { %954 = vmatprep.subr.bf16.mxu1 (!%p248_p2), %v1112_v7  ;;  %v1117_v18 = vld [vmem:[%s1371_s3 + $0x18] sm:$0xff] (!%p248_p2)   ;;  %v1119_v22 = vld [vmem:[%s1371_s3 + $0x20] sm:$0xff] (!%p248_p2)   ;;  %v1121_v40 = vld [vmem:[%s1371_s3 + $0x28] sm:$0xff] (!%p248_p2)  }
   0xc   : > { %387 = vmatpush1.bf16.msra.mxu0 (!%p248_p2), %v1109_v4  ;;  %v1122_v41 = vld [vmem:[%s1371_s3 + $0x70] sm:$0xff] (!%p248_p2)   ;;  %v1124_v43 = vld [vmem:[%s1371_s3 + $0x78] sm:$0xff] (!%p248_p2)   ;;  %v327_v48 = vld [vmem:[%s1370_s2] sm:$0x3] (!%p248_p2) }
   0xd   : > { %v1123_v42 = vld [vmem:[%s1371_s3 + $0x30] sm:$0xff] (!%p248_p2)   ;;  %v1125_v44 = vld [vmem:[%s1371_s3 + $0x38] sm:$0xff] (!%p248_p2)   ;;  %v1292_v50 = vrot.slane (!%p248_p2), %v327_v48, %v331_v47  ;;  %v1294_v51 = vrot.slane (!%p248_p2), %v327_v48, %v335_v49 }
   0xe   : > { %s1377_s6 = smov (!%p286_p3, %s919_s6), 24  ;;  %955 = vmatpush3.bf16.msra.mxu1 %v1113_v8  ;;  %s1379_s27 = smov (!%p295_p4, %s1187_s27), 1 }
   0xf   : > { %s920_s17 = sshll.u32 %s1377_s6, 3  ;;  %956 = vmatprep.subr.bf16.mxu1 %v1114_v14  ;;  %s297_s14 = scalar_lea.vmem %s1375_s7, %s1379_s27 }
  0x10   : > { %s1217_s22 = scalar_lea.vmem %s1368_s0, %s920_s17 }
  0x11   : > { %v299_v9 = vld [vmem:[%s1217_s22] sm:$0xff]  ;;  %v300_v10 = vld [vmem:[%s1217_s22 + $0x8] sm:$0xff]  ;;  %v301_v12 = vld [vmem:[%s1217_s22 + $0x10] sm:$0xff] }
  0x12   : > { %v315_v11 = vpack.c.bf16 %v300_v10, %v299_v9  ;;  %v302_v13 = vld [vmem:[%s1217_s22 + $0x18] sm:$0xff]  ;;  %957 = vmatpush3.bf16.msra.mxu1 %v1115_v15  ;;  %v303_v20 = vld [vmem:[%s1217_s22 + $0x20] sm:$0xff]  ;;  %v304_v21 = vld [vmem:[%s1217_s22 + $0x28] sm:$0xff] }
  0x13   : > { %v316_v16 = vpack.c.bf16 %v302_v13, %v301_v12  ;;  %958 = vmatprep.subr.bf16.mxu1 %v1116_v17  ;;  %v317_v24 = vpack.c.bf16 %v304_v21, %v303_v20  ;;  %v305_v25 = vld [vmem:[%s1217_s22 + $0x30] sm:$0xff]  ;;  %v306_v26 = vld [vmem:[%s1217_s22 + $0x38] sm:$0xff]  ;;  %v307_v28 = vld [vmem:[%s1217_s22 + $0x40] sm:$0xff] }
  0x14   : > { %925 = vmatmul.mubr.msk.bf16.vlgmr.msra.gmra.mrb[0].mxu0 %vm359_vm0, %v315_v11  ;;  %v318_v27 = vpack.c.bf16 %v306_v26, %v305_v25  ;;  %v308_v29 = vld [vmem:[%s1217_s22 + $0x48] sm:$0xff]  ;;  %v309_v31 = vld [vmem:[%s1217_s22 + $0x50] sm:$0xff]  ;;  %v310_v32 = vld [vmem:[%s1217_s22 + $0x58] sm:$0xff] }
  0x15   : > { %426 = vmatprep.mubr.bf16.mxu0 %v1134_v2  ;;  %v319_v30 = vpack.c.bf16 %v308_v29, %v307_v28  ;;  %v320_v33 = vpack.c.bf16 %v310_v32, %v309_v31  ;;  %v311_v34 = vld [vmem:[%s1217_s22 + $0x60] sm:$0xff]  ;;  %v312_v35 = vld [vmem:[%s1217_s22 + $0x68] sm:$0xff]  ;;  %v313_v37 = vld [vmem:[%s1217_s22 + $0x70] sm:$0xff] }
  0x16   : > { %959 = vmatpush3.bf16.msra.mxu1 %v1117_v18  ;;  %v321_v36 = vpack.c.bf16 %v312_v35, %v311_v34  ;;  %v314_v38 = vld [vmem:[%s1217_s22 + $0x78] sm:$0xff] }
  0x17   : > { %960 = vmatprep.subr.bf16.mxu1 %v1118_v19  ;;  %v322_v39 = vpack.c.bf16 %v314_v38, %v313_v37 }
  0x1a   : > { %961 = vmatpush3.bf16.msra.mxu1 %v1119_v22 }
  0x1b   : > { %962 = vmatprep.subr.bf16.mxu1 %v1120_v23 }
  0x1c   : > { %926 = vmatmul.mubr.msk.bf16.gmra.mrb[4].mxu0 %vm359_vm0, %v316_v16 }
  0x1d   : > { %436 = vmatprep.mubr.bf16.mxu0 %v1134_v2 }
  0x1e   : > { %963 = vmatpush3.bf16.msra.mxu1 %v1121_v40 }
  0x1f   : > { %964 = vmatprep.subr.bf16.mxu1 %v1122_v41 }
  0x22   : > { %965 = vmatpush3.bf16.msra.mxu1 %v1123_v42 }
  0x23   : > { %966 = vmatprep.subr.bf16.mxu1 %v1124_v43 }
  0x24   : > { %927 = vmatmul.mubr.msk.bf16.gmra.mrb[8].mxu0 %vm359_vm0, %v317_v24 }
  0x25   : > { %446 = vmatprep.mubr.bf16.mxu0 %v1134_v2 }
  0x26   : > { %967 = vmatpush3.bf16.msra.mxu1 %v1125_v44 }
  0x2c   : > { %928 = vmatmul.mubr.msk.bf16.gmra.mrb[12].mxu0 %vm359_vm0, %v318_v27 }
  0x2d   : > { %456 = vmatprep.mubr.bf16.mxu0 %v1134_v2 }
  0x34   : > { %929 = vmatmul.mubr.msk.bf16.gmra.mrb[16].mxu0 %vm359_vm0, %v319_v30 }
  0x35   : > { %466 = vmatprep.mubr.bf16.mxu0 %v1134_v2 }
  0x3c   : > { %930 = vmatmul.mubr.msk.bf16.gmra.mrb[20].mxu0 %vm359_vm0, %v320_v33 }
  0x3d   : > { %476 = vmatprep.mubr.bf16.mxu0 %v1134_v2 }
  0x44   : > { %931 = vmatmul.mubr.msk.bf16.gmra.mrb[24].mxu0 %vm359_vm0, %v321_v36 }
  0x45   : > { %486 = vmatprep.mubr.bf16.mxu0 %v1134_v2 }
  0x4c   : > { %932 = vmatmul.mubr.msk.bf16.gmra.mrb[28].mxu0 %vm359_vm0, %v322_v39 }
  0xe7   : > { %v418_v52 = vpop.f32.mrb[0].mxu0 }
  0xe8   : > { %v419_v53 = vadd.f32 %v418_v52, %v1292_v50  ;;  %v420_v54 = vpop.f32.mrb[1].mxu0 }
  0xe9   : > { %v421_v55 = vadd.f32 %v420_v54, %v1294_v51  ;;  %v422_v56 = vpop.f32.mrb[2].mxu0 }
  0xea   : > { %v423_v57 = vadd.f32 %v422_v56, %v1292_v50  ;;  %v424_v58 = vpop.f32.mrb[3].mxu0  ;;  %v497_v60 = vmax.f32 %v419_v53, 0.0 }
  0xeb   : > { %v425_v59 = vadd.f32 %v424_v58, %v1294_v51  ;;  %v498_v62 = vmax.f32 %v421_v55, 0.0 }
  0xec   : > { %v499_v61 = vmax.f32 %v423_v57, 0.0 }
  0xed   : > { %v500_v63 = vmax.f32 %v425_v59, 0.0 }
  0xee   : > { %v529_v0 = vpack.c.bf16 %v499_v61, %v497_v60 }
  0xef   : > { %v428_v1 = vpop.f32.mrb[4].mxu0  ;;  %v530_v2 = vpack.c.bf16 %v500_v63, %v498_v62 }
  0xf0   : > { %v429_v3 = vadd.f32 %v428_v1, %v1292_v50  ;;  %v430_v4 = vpop.f32.mrb[5].mxu0 }
  0xf1   : > { %v431_v5 = vadd.f32 %v430_v4, %v1294_v51  ;;  %v432_v6 = vpop.f32.mrb[6].mxu0  ;;  %712 = vmatprep.mubr.bf16.mxu1 %v530_v2 }
  0xf2   : > { %v433_v7 = vadd.f32 %v432_v6, %v1292_v50  ;;  %v434_v8 = vpop.f32.mrb[7].mxu0  ;;  %713 = vmatmul.mubr.bf16.vlgmr.msra.gmra.mrb[0].mxu1 %v529_v0  ;;  %v501_v10 = vmax.f32 %v429_v3, 0.0 }
  0xf3   : > { %v435_v9 = vadd.f32 %v434_v8, %v1294_v51  ;;  %v502_v12 = vmax.f32 %v431_v5, 0.0 }
  0xf4   : > { %v503_v11 = vmax.f32 %v433_v7, 0.0 }
  0xf5   : > { %v504_v13 = vmax.f32 %v435_v9, 0.0 }
  0xf6   : > { %v531_v14 = vpack.c.bf16 %v503_v11, %v501_v10 }
  0xf7   : > { %v532_v15 = vpack.c.bf16 %v504_v13, %v502_v12  ;;  %v438_v16 = vpop.f32.mrb[8].mxu0 }
  0xf8   : > { %v439_v17 = vadd.f32 %v438_v16, %v1292_v50  ;;  %v440_v18 = vpop.f32.mrb[9].mxu0 }
  0xf9   : > { %v441_v19 = vadd.f32 %v440_v18, %v1294_v51  ;;  %v442_v20 = vpop.f32.mrb[10].mxu0  ;;  %720 = vmatprep.mubr.bf16.mxu1 %v532_v15 }
  0xfa   : > { %v443_v21 = vadd.f32 %v442_v20, %v1292_v50  ;;  %v444_v22 = vpop.f32.mrb[11].mxu0  ;;  %721 = vmatmul.mubr.bf16.gmra.mrb[4].mxu1 %v531_v14  ;;  %v505_v24 = vmax.f32 %v439_v17, 0.0 }
  0xfb   : > { %v445_v23 = vadd.f32 %v444_v22, %v1294_v51  ;;  %v506_v26 = vmax.f32 %v441_v19, 0.0 }
  0xfc   : > { %v507_v25 = vmax.f32 %v443_v21, 0.0 }
  0xfd   : > { %v508_v27 = vmax.f32 %v445_v23, 0.0 }
  0xfe   : > { %v533_v28 = vpack.c.bf16 %v507_v25, %v505_v24 }
  0xff   : > { %v534_v29 = vpack.c.bf16 %v508_v27, %v506_v26  ;;  %v448_v30 = vpop.f32.mrb[12].mxu0 }
 0x100   : > { %v449_v31 = vadd.f32 %v448_v30, %v1292_v50  ;;  %v450_v32 = vpop.f32.mrb[13].mxu0 }
 0x101   : > { %v451_v33 = vadd.f32 %v450_v32, %v1294_v51  ;;  %v452_v34 = vpop.f32.mrb[14].mxu0  ;;  %728 = vmatprep.mubr.bf16.mxu1 %v534_v29 }
 0x102   : > { %v453_v35 = vadd.f32 %v452_v34, %v1292_v50  ;;  %v454_v36 = vpop.f32.mrb[15].mxu0  ;;  %729 = vmatmul.mubr.bf16.gmra.mrb[8].mxu1 %v533_v28  ;;  %v509_v38 = vmax.f32 %v449_v31, 0.0 }
 0x103   : > { %v455_v37 = vadd.f32 %v454_v36, %v1294_v51  ;;  %v510_v40 = vmax.f32 %v451_v33, 0.0 }
 0x104   : > { %v511_v39 = vmax.f32 %v453_v35, 0.0 }
 0x105   : > { %v512_v41 = vmax.f32 %v455_v37, 0.0 }
 0x106   : > { %v535_v42 = vpack.c.bf16 %v511_v39, %v509_v38  ;;  %v1135_v38 = vmov 0.0|0.0   ;;  %v1137_v39 = vmov 0.0  }
 0x107   : > { %v536_v43 = vpack.c.bf16 %v512_v41, %v510_v40  ;;  %v458_v44 = vpop.f32.mrb[16].mxu0  ;;  %1068 = vmatprep.subr.bf16.mxu0 %v1135_v38  ;;  %1065 = vmatprep.mubr.msk.f32.mxu0 %vm1136_vm1, %v1137_v39 }
 0x108   : > { %v459_v45 = vadd.f32 %v458_v44, %v1292_v50  ;;  %v460_v46 = vpop.f32.mrb[17].mxu0 }
 0x109   : > { %v461_v47 = vadd.f32 %v460_v46, %v1294_v51  ;;  %v462_v48 = vpop.f32.mrb[18].mxu0  ;;  %736 = vmatprep.mubr.bf16.mxu1 %v536_v43 }
 0x10a   : > { %v463_v49 = vadd.f32 %v462_v48, %v1292_v50  ;;  %v464_v52 = vpop.f32.mrb[19].mxu0  ;;  %737 = vmatmul.mubr.bf16.gmra.mrb[12].mxu1 %v535_v42  ;;  %v513_v54 = vmax.f32 %v459_v45, 0.0 }
 0x10b   : > { %v465_v53 = vadd.f32 %v464_v52, %v1294_v51  ;;  %v514_v56 = vmax.f32 %v461_v47, 0.0 }
 0x10c   : > { %v515_v55 = vmax.f32 %v463_v49, 0.0 }
 0x10d   : > { %v516_v57 = vmax.f32 %v465_v53, 0.0 }
 0x10e   : > { %v537_v58 = vpack.c.bf16 %v515_v55, %v513_v54 }
 0x10f   : > { %v538_v59 = vpack.c.bf16 %v516_v57, %v514_v56  ;;  %v468_v60 = vpop.f32.mrb[20].mxu0 }
 0x110   : > { %v469_v61 = vadd.f32 %v468_v60, %v1292_v50  ;;  %v470_v62 = vpop.f32.mrb[21].mxu0 }
 0x111   : > { %v471_v63 = vadd.f32 %v470_v62, %v1294_v51  ;;  %v472_v0 = vpop.f32.mrb[22].mxu0  ;;  %744 = vmatprep.mubr.bf16.mxu1 %v538_v59 }
 0x112   : > { %v473_v1 = vadd.f32 %v472_v0, %v1292_v50  ;;  %v474_v2 = vpop.f32.mrb[23].mxu0  ;;  %745 = vmatmul.mubr.bf16.gmra.mrb[16].mxu1 %v537_v58  ;;  %v517_v4 = vmax.f32 %v469_v61, 0.0 }
 0x113   : > { %v475_v3 = vadd.f32 %v474_v2, %v1294_v51  ;;  %v518_v6 = vmax.f32 %v471_v63, 0.0 }
 0x114   : > { %v519_v5 = vmax.f32 %v473_v1, 0.0 }
 0x115   : > { %v520_v7 = vmax.f32 %v475_v3, 0.0 }
 0x116   : > { %v539_v8 = vpack.c.bf16 %v519_v5, %v517_v4 }
 0x117   : > { %v540_v9 = vpack.c.bf16 %v520_v7, %v518_v6  ;;  %v478_v10 = vpop.f32.mrb[24].mxu0 }
 0x118   : > { %v479_v11 = vadd.f32 %v478_v10, %v1292_v50  ;;  %v480_v12 = vpop.f32.mrb[25].mxu0 }
 0x119   : > { %v481_v13 = vadd.f32 %v480_v12, %v1294_v51  ;;  %v482_v14 = vpop.f32.mrb[26].mxu0  ;;  %752 = vmatprep.mubr.bf16.mxu1 %v540_v9 }
 0x11a   : > { %v483_v15 = vadd.f32 %v482_v14, %v1292_v50  ;;  %v484_v16 = vpop.f32.mrb[27].mxu0  ;;  %753 = vmatmul.mubr.bf16.gmra.mrb[20].mxu1 %v539_v8  ;;  %v521_v18 = vmax.f32 %v479_v11, 0.0 }
 0x11b   : > { %v485_v17 = vadd.f32 %v484_v16, %v1294_v51  ;;  %v522_v20 = vmax.f32 %v481_v13, 0.0 }
 0x11c   : > { %v523_v19 = vmax.f32 %v483_v15, 0.0 }
 0x11d   : > { %v524_v21 = vmax.f32 %v485_v17, 0.0 }
 0x11e   : > { %v541_v22 = vpack.c.bf16 %v523_v19, %v521_v18 }
 0x11f   : > { %v542_v23 = vpack.c.bf16 %v524_v21, %v522_v20  ;;  %v488_v24 = vpop.f32.mrb[28].mxu0 }
 0x120   : > { %v489_v25 = vadd.f32 %v488_v24, %v1292_v50  ;;  %v490_v26 = vpop.f32.mrb[29].mxu0 }
 0x121   : > { %v491_v27 = vadd.f32 %v490_v26, %v1294_v51  ;;  %v492_v28 = vpop.f32.mrb[30].mxu0  ;;  %760 = vmatprep.mubr.bf16.mxu1 %v542_v23 }
 0x122   : > { %v493_v29 = vadd.f32 %v492_v28, %v1292_v50  ;;  %v494_v30 = vpop.f32.mrb[31].mxu0  ;;  %761 = vmatmul.mubr.bf16.gmra.mrb[24].mxu1 %v541_v22  ;;  %v525_v32 = vmax.f32 %v489_v25, 0.0  ;;  %v1332_v50 = vld [vmem:[%s1372_s4] ss:$0 sm:$0xff] }
 0x123   : > { %v495_v31 = vadd.f32 %v494_v30, %v1294_v51  ;;  %v526_v34 = vmax.f32 %v491_v27, 0.0 }
 0x124   : > { %v527_v33 = vmax.f32 %v493_v29, 0.0 }
 0x125   : > { %v528_v35 = vmax.f32 %v495_v31, 0.0 }
 0x126   : > { %v543_v36 = vpack.c.bf16 %v527_v33, %v525_v32 }
 0x127   : > { %v544_v37 = vpack.c.bf16 %v528_v35, %v526_v34 }
 0x129   : > { %768 = vmatprep.mubr.bf16.mxu1 %v544_v37 }
 0x12a   : > { %769 = vmatmul.mubr.bf16.gmra.mrb[28].mxu1 %v543_v36 }
 0x1c5   : > { %v968_v40 = vpop.f32.mrb[0].mxu1 }
 0x1c6   : > { %v969_v51 = vpop.f32.mrb[1].mxu1 }
 0x1c7   : > { %v970_v41 = vadd.f32 %v969_v51, %v968_v40  ;;  %v971_v42 = vpop.f32.mrb[2].mxu1 }
 0x1c8   : > { %v972_v43 = vpop.f32.mrb[3].mxu1 }
 0x1c9   : > { %v715_v44 = vadd.f32 %v970_v41, %v1332_v50  ;;  %v973_v45 = vadd.f32 %v972_v43, %v971_v42 }
 0x1cb   : > { %v718_v46 = vadd.f32 %v973_v45, %v1332_v50  ;;  %v777_v47 = vmax.f32 %v715_v44, 0.0 }
 0x1cd   : > { %v778_v48 = vmax.f32 %v718_v46, 0.0  ;;  %v974_v49 = vpop.f32.mrb[4].mxu1 }
 0x1ce   : > { %v975_v52 = vpop.f32.mrb[5].mxu1 }
 0x1cf   : > { %v1069_v53 = vpack.c.bf16 %v778_v48, %v777_v47  ;;  %v976_v54 = vadd.f32 %v975_v52, %v974_v49  ;;  %v977_v55 = vpop.f32.mrb[6].mxu1 }
 0x1d0   : > { %v978_v56 = vpop.f32.mrb[7].mxu1 }
 0x1d1   : > { %v723_v57 = vadd.f32 %v976_v54, %v1332_v50  ;;  %v979_v58 = vadd.f32 %v978_v56, %v977_v55  ;;  %1070 = vmatpush3.bf16.xpose.msra.mxu0 %v1069_v53 }
 0x1d2   : > { %1071 = vmatprep.subr.bf16.mxu0 %v1135_v38 }
 0x1d3   : > { %v726_v59 = vadd.f32 %v979_v58, %v1332_v50  ;;  %v779_v60 = vmax.f32 %v723_v57, 0.0 }
 0x1d5   : > { %v780_v61 = vmax.f32 %v726_v59, 0.0  ;;  %v980_v62 = vpop.f32.mrb[8].mxu1 }
 0x1d6   : > { %v981_v63 = vpop.f32.mrb[9].mxu1 }
 0x1d7   : > { %v1072_v0 = vpack.c.bf16 %v780_v61, %v779_v60  ;;  %v982_v1 = vadd.f32 %v981_v63, %v980_v62  ;;  %v983_v2 = vpop.f32.mrb[10].mxu1 }
 0x1d8   : > { %v984_v3 = vpop.f32.mrb[11].mxu1 }
 0x1d9   : > { %v731_v4 = vadd.f32 %v982_v1, %v1332_v50  ;;  %v985_v5 = vadd.f32 %v984_v3, %v983_v2  ;;  %1073 = vmatpush3.bf16.xpose.msra.mxu0 %v1072_v0  ;;  %v793_v3 = vld [vmem:[%s1373_s5] sm:$0x1] }
 0x1da   : > { %1074 = vmatprep.subr.bf16.mxu0 %v1135_v38 }
 0x1db   : > { %v734_v6 = vadd.f32 %v985_v5, %v1332_v50  ;;  %v781_v7 = vmax.f32 %v731_v4, 0.0  ;;  %v795_v4 = vstv %s794_s11 }
 0x1dd   : > { %v782_v8 = vmax.f32 %v734_v6, 0.0  ;;  %v986_v9 = vpop.f32.mrb[12].mxu1 }
 0x1de   : > { %v987_v10 = vpop.f32.mrb[13].mxu1 }
 0x1df   : > { %v1075_v11 = vpack.c.bf16 %v782_v8, %v781_v7  ;;  %v988_v12 = vadd.f32 %v987_v10, %v986_v9  ;;  %v989_v13 = vpop.f32.mrb[14].mxu1 }
 0x1e0   : > { %v990_v14 = vpop.f32.mrb[15].mxu1 }
 0x1e1   : > { %v739_v15 = vadd.f32 %v988_v12, %v1332_v50  ;;  %v991_v16 = vadd.f32 %v990_v14, %v989_v13  ;;  %1076 = vmatpush3.bf16.xpose.msra.mxu0 %v1075_v11 }
 0x1e2   : > { %1077 = vmatprep.subr.bf16.mxu0 %v1135_v38 }
 0x1e3   : > { %v742_v17 = vadd.f32 %v991_v16, %v1332_v50  ;;  %v783_v18 = vmax.f32 %v739_v15, 0.0 }
 0x1e5   : > { %v784_v19 = vmax.f32 %v742_v17, 0.0  ;;  %v992_v20 = vpop.f32.mrb[16].mxu1 }
 0x1e6   : > { %v993_v21 = vpop.f32.mrb[17].mxu1 }
 0x1e7   : > { %v1078_v22 = vpack.c.bf16 %v784_v19, %v783_v18  ;;  %v994_v23 = vadd.f32 %v993_v21, %v992_v20  ;;  %v995_v24 = vpop.f32.mrb[18].mxu1 }
 0x1e8   : > { %v996_v25 = vpop.f32.mrb[19].mxu1 }
 0x1e9   : > { %v747_v26 = vadd.f32 %v994_v23, %v1332_v50  ;;  %v997_v27 = vadd.f32 %v996_v25, %v995_v24  ;;  %1079 = vmatpush3.bf16.xpose.msra.mxu0 %v1078_v22 }
 0x1ea   : > { %1080 = vmatprep.subr.bf16.mxu0 %v1135_v38 }
 0x1eb   : > { %v750_v28 = vadd.f32 %v997_v27, %v1332_v50  ;;  %v785_v29 = vmax.f32 %v747_v26, 0.0 }
 0x1ed   : > { %v786_v30 = vmax.f32 %v750_v28, 0.0  ;;  %v998_v31 = vpop.f32.mrb[20].mxu1 }
 0x1ee   : > { %v999_v32 = vpop.f32.mrb[21].mxu1 }
 0x1ef   : > { %v1081_v33 = vpack.c.bf16 %v786_v30, %v785_v29  ;;  %v1000_v34 = vadd.f32 %v999_v32, %v998_v31  ;;  %v1001_v35 = vpop.f32.mrb[22].mxu1 }
 0x1f0   : > { %v1002_v36 = vpop.f32.mrb[23].mxu1 }
 0x1f1   : > { %v755_v37 = vadd.f32 %v1000_v34, %v1332_v50  ;;  %v1003_v39 = vadd.f32 %v1002_v36, %v1001_v35  ;;  %1082 = vmatpush3.bf16.xpose.msra.mxu0 %v1081_v33 }
 0x1f2   : > { %1083 = vmatprep.subr.bf16.mxu0 %v1135_v38 }
 0x1f3   : > { %v758_v40 = vadd.f32 %v1003_v39, %v1332_v50  ;;  %v787_v51 = vmax.f32 %v755_v37, 0.0 }
 0x1f5   : > { %v788_v41 = vmax.f32 %v758_v40, 0.0  ;;  %v1004_v42 = vpop.f32.mrb[24].mxu1 }
 0x1f6   : > { %v1005_v43 = vpop.f32.mrb[25].mxu1 }
 0x1f7   : > { %v1084_v44 = vpack.c.bf16 %v788_v41, %v787_v51  ;;  %v1006_v45 = vadd.f32 %v1005_v43, %v1004_v42  ;;  %v1007_v46 = vpop.f32.mrb[26].mxu1 }
 0x1f8   : > { %v1008_v47 = vpop.f32.mrb[27].mxu1 }
 0x1f9   : > { %v763_v48 = vadd.f32 %v1006_v45, %v1332_v50  ;;  %v1009_v49 = vadd.f32 %v1008_v47, %v1007_v46  ;;  %1085 = vmatpush3.bf16.xpose.msra.mxu0 %v1084_v44 }
 0x1fa   : > { %1086 = vmatprep.subr.bf16.mxu0 %v1135_v38 }
 0x1fb   : > { %v766_v52 = vadd.f32 %v1009_v49, %v1332_v50  ;;  %v789_v53 = vmax.f32 %v763_v48, 0.0 }
 0x1fd   : > { %v790_v54 = vmax.f32 %v766_v52, 0.0  ;;  %v1010_v55 = vpop.f32.mrb[28].mxu1 }
 0x1fe   : > { %v1011_v56 = vpop.f32.mrb[29].mxu1 }
 0x1ff   : > { %v1087_v57 = vpack.c.bf16 %v790_v54, %v789_v53  ;;  %v1012_v58 = vadd.f32 %v1011_v56, %v1010_v55  ;;  %v1013_v59 = vpop.f32.mrb[30].mxu1 }
 0x200   : > { %v1014_v60 = vpop.f32.mrb[31].mxu1 }
 0x201   : > { %v771_v61 = vadd.f32 %v1012_v58, %v1332_v50  ;;  %v1015_v62 = vadd.f32 %v1014_v60, %v1013_v59  ;;  %1088 = vmatpush3.bf16.xpose.msra.mxu0 %v1087_v57 }
 0x202   : > { %1089 = vmatprep.subr.bf16.mxu0 %v1135_v38 }
 0x203   : > { %v774_v63 = vadd.f32 %v1015_v62, %v1332_v50  ;;  %v791_v0 = vmax.f32 %v771_v61, 0.0 }
 0x205   : > { %v792_v1 = vmax.f32 %v774_v63, 0.0 }
 0x207   : > { %v1090_v2 = vpack.c.bf16 %v792_v1, %v791_v0 }
 0x209   : > { %1091 = vmatpush3.bf16.xpose.msra.mxu0 %v1090_v2 }
 0x210   : > { %1066 = vmatmul.mubr.f32.vlgmr.msra.gmra.mrb[32].mxu0 %v793_v3 }
 0x2e3   : > { %v862_v38 = vpop.f32.mrb[32].mxu0 }
 0x2e4   : > { %v863_v5 = vadd.f32 %v862_v38, %v795_v4  ;;  %v1067_v50 = vpop.f32.mrb[33].mxu0 }
 0x2e6   : > { %866 = vst [vmem:[%s297_s14] sm:$0x1] %v863_v5 }
 0x2e7 PF: > { %s18_s26 = sadd.s32 1, %s1132_s26  }
 0x2e8   : > { %p15_p5 = scmp.ge.s32.totalorder %s18_s26, 4  }
 0x2ea   :  { %17 = sbr.rel (!%p15_p5) target bundleno = 2 (0x2), region = 78 }

</bundles_post_ra>
